<compile_context>
chip_gen: v5e
topology: v5e:2x2
jax: 0.10.0
libtpu: 0.0.40
codegen_flags: <defaults>
</compile_context>

<pallas_src>
import functools

import jax
import jax.numpy as jnp
from jax.experimental import pallas as pl
from jax.experimental.pallas import tpu as pltpu


def _round_up(x, m):
    return ((x + m - 1) // m) * m


# ---------------------------------------------------------------------------
# 1) One-shot prepare kernel:  fused_table[v] = emb_table[v] @ W^T + b
#    Run once per weight update (hoisted out of the per-forward path).
# ---------------------------------------------------------------------------
def _fuse_table_kernel(tbl_ref, w_ref, b_ref, out_ref, *, num_valid_rows):
    acc = jnp.dot(tbl_ref[...], w_ref[...], preferred_element_type=jnp.float32)
    acc = acc + b_ref[...]
    # Zero the padded vocab rows so an out-of-range (clipped) index can only ever
    # read zeros, never the bare bias.
    row = jax.lax.broadcasted_iota(jnp.int32, acc.shape, 0)
    out_ref[...] = jnp.where(row < num_valid_rows, acc, 0.0).astype(out_ref.dtype)


@functools.partial(jax.jit, static_argnames=("out_dtype",))
def prepare_fused_table(emb_table, w, b, *, out_dtype=jnp.bfloat16):
    """emb_table: (V+1, F); w: (D, F) = nn.Linear weight; b: (D,) -> fused (Vp, Dp).

    bf16 by default: the per-token gather kernel is HBM-write bound, so halving
    table/output bytes is ~2x there.  Pass out_dtype=jnp.float32 for exact checks.
    """
    Vp1, F = emb_table.shape
    D = w.shape[0]
    # Lane-dense padding; keep Vp at 128 (119 -> 128) — padding further to the
    # 256-deep v6e/v7x MXU would only add VPU/VMEM cost on an HBM-bound kernel.
    Vp = _round_up(Vp1, 128)
    Fp = _round_up(F, 128)
    Dp = _round_up(D, 128)

    tbl_p = jnp.zeros((Vp, Fp), jnp.float32).at[:Vp1, :F].set(emb_table.astype(jnp.float32))
    w_p = jnp.zeros((Fp, Dp), jnp.float32).at[:F, :D].set(w.T.astype(jnp.float32))
    b_p = jnp.zeros((1, Dp), jnp.float32).at[0, :D].set(b.astype(jnp.float32))

    return pl.pallas_call(
        functools.partial(_fuse_table_kernel, num_valid_rows=Vp1),
        out_shape=jax.ShapeDtypeStruct((Vp, Dp), out_dtype),
    )(tbl_p, w_p, b_p)


# ---------------------------------------------------------------------------
# 2) Per-token gather kernel: out[t] = fused_table[idx[t]]
# ---------------------------------------------------------------------------
def _gather_kernel(idx_ref, tbl_ref, out_ref):
    # idx_ref: (1, TM)  int32 -- lane-dense row of token indices for this block
    # tbl_ref: (Vp, Dp)       -- fused projected table, VMEM-resident (one copy)
    # out_ref: (TM, Dp)       -- lane-dense output block
    v_pad = tbl_ref.shape[0]
    tm = out_ref.shape[0]
    # one_hot[v, t] = (v == idx[t]): pure broadcast compare, no index transpose needed.
    vocab_ids = jax.lax.broadcasted_iota(jnp.int32, (v_pad, tm), 0)
    one_hot = (vocab_ids == idx_ref[...]).astype(tbl_ref.dtype)            # (Vp, TM)
    # Gather-as-matmul on the MXU, contracting the vocab dim of both operands
    # (transposed-LHS form); bias is already folded into the table.
    out = jax.lax.dot_general(
        one_hot, tbl_ref[...],
        dimension_numbers=(((0,), (0,)), ((), ())),
        preferred_element_type=jnp.float32,
    )                                                                       # (TM, Dp)
    out_ref[...] = out.astype(out_ref.dtype)


def _select_tm(n_tokens, tm_max):
    """Tokens per grid step.

    Large blocks amortize the ~0.35 us per-step overhead; the //4 term keeps
    >= ~4 grid blocks when there is enough work so the "parallel" axis can be
    split across both v7x TensorCores.  tm_max=1024 is safe for v5e's 16 MiB
    default scoped VMEM even in f32; with the bf16 table 2048-4096 is a good
    choice on v7x.
    """
    tm = _round_up(max((n_tokens + 3) // 4, 1), 128)
    return int(max(128, min(tm_max, tm)))


@functools.partial(jax.jit, static_argnames=("num_embeddings", "d_model", "tm_max"))
def embedder_forward(src, fused_table, *, num_embeddings, d_model, tm_max=1024):
    """src: (B, S) int element indices -> (B, S, d_model) in fused_table.dtype."""
    B, S = src.shape
    Vp, Dp = fused_table.shape
    out_dtype = fused_table.dtype
    itemsize = jnp.dtype(out_dtype).itemsize

    N = B * S
    tm = _select_tm(N, tm_max)
    Np = _round_up(N, tm)
    nb = Np // tm

    # Clip (defense in depth; padded fused rows are zero anyway) and pad the token
    # axis with index 0 (the zeros pad row).  Lane-dense (nb, TM) layout -> one
    # contiguous DMA per grid step instead of TM tiny 4-byte rows.
    src_flat = jnp.clip(src.reshape(-1).astype(jnp.int32), 0, num_embeddings - 1)
    idx_blocks = jnp.zeros((Np,), jnp.int32).at[:N].set(src_flat).reshape(nb, tm)

    # Explicit scoped-VMEM budget (v5e default is only 16 MiB): double-buffered
    # output + idx blocks, one resident table copy, one-hot / iota / f32-acc
    # intermediates, plus generous slack.  Capped below v7x's 64 MiB physical VMEM.
    out_block = tm * Dp * itemsize
    idx_block = tm * 4
    tbl_bytes = Vp * Dp * itemsize
    onehot_bytes = Vp * tm * (itemsize + 4)
    acc_bytes = tm * Dp * 4
    budget = 2 * out_block + 2 * idx_block + tbl_bytes + onehot_bytes + acc_bytes
    vmem_limit = int(min(48 * 1024 * 1024, max(2 * budget + (4 << 20), 16 << 20)))

    out_p = pl.pallas_call(
        _gather_kernel,
        out_shape=jax.ShapeDtypeStruct((Np, Dp), out_dtype),
        grid=(nb,),
        in_specs=[
            # Lane-dense index row for this block.
            pl.BlockSpec((1, tm), lambda i: (i, 0)),
            # Fused table: placed whole in VMEM once, resident for the entire grid
            # (single copy; no per-step pipeline double-buffer for a constant block).
            pl.BlockSpec(memory_space=pltpu.MemorySpace.VMEM),
        ],
        out_specs=pl.BlockSpec((tm, Dp), lambda i: (i, 0)),
        compiler_params=pltpu.CompilerParams(
            dimension_semantics=("parallel",),   # independent blocks -> both TCs on v7x
            vmem_limit_bytes=vmem_limit,
        ),
    )(idx_blocks, fused_table)

    return out_p[:N, :d_model].reshape(B, S, d_model)


# ---------------------------------------------------------------------------
# Synthetic parameters (stand-in for mat2vec.csv + nn.Linear init)
# ---------------------------------------------------------------------------
def make_params(key, vocab, feat_size, d_model):
    k_tbl, k_w, k_b = jax.random.split(key, 3)
    cbfv = jax.random.normal(k_tbl, (vocab, feat_size), dtype=jnp.float32)
    emb_table = jnp.concatenate(
        [jnp.zeros((1, feat_size), dtype=jnp.float32), cbfv], axis=0
    )
    bound = 1.0 / (feat_size ** 0.5)
    w = jax.random.uniform(k_w, (d_model, feat_size), jnp.float32, -bound, bound)
    b = jax.random.uniform(k_b, (d_model,), jnp.float32, -bound, bound)
    return emb_table, w, b


if __name__ == "__main__":
    key = jax.random.PRNGKey(0)

    # Small shapes consistent with the module: batch=2, seq=8 element indices,
    # synthetic feat_size=64 (real mat2vec is 200), d_model=32 (real 512), 118 elements.
    B, S = 2, 8
    feat_size, d_model, vocab = 64, 32, 118

    k_params, k_src, k_src2 = jax.random.split(key, 3)
    emb_table, w, b = make_params(k_params, vocab, feat_size, d_model)
    src = jax.random.randint(k_src, (B, S), 0, vocab + 1, dtype=jnp.int32)

    # Pure-JAX reference of the PyTorch Embedder forward at HIGHEST precision so the
    # f32 tolerance check is meaningful (review's correctness note).
    def reference(s):
        return jnp.matmul(emb_table[s], w.T, precision=jax.lax.Precision.HIGHEST) + b

    ref = reference(src)

    # f32 path: tight check against the reference.
    fused_f32 = prepare_fused_table(emb_table, w, b, out_dtype=jnp.float32)
    out_f32 = embedder_forward(src, fused_f32, num_embeddings=vocab + 1, d_model=d_model)
    out_f32 = jax.block_until_ready(out_f32)
    assert out_f32.shape == (B, S, d_model), out_f32.shape
    assert jnp.allclose(out_f32, ref, atol=1e-5, rtol=1e-5), float(
        jnp.max(jnp.abs(out_f32 - ref)))

    # bf16 production path (default): half the HBM write traffic on the mem-bound
    # gather; checked at bf16 tolerance.
    fused_bf16 = prepare_fused_table(emb_table, w, b)
    out_bf16 = embedder_forward(src, fused_bf16, num_embeddings=vocab + 1, d_model=d_model)
    out_bf16 = jax.block_until_ready(out_bf16).astype(jnp.float32)
    assert out_bf16.shape == (B, S, d_model), out_bf16.shape
    assert jnp.allclose(out_bf16, ref, atol=3e-2, rtol=3e-2), float(
        jnp.max(jnp.abs(out_bf16 - ref)))

    # A second, slightly larger shape to exercise a multi-block grid (padding of the
    # token axis + the "parallel" block axis).
    B2, S2 = 16, 9
    src2 = jax.random.randint(k_src2, (B2, S2), 0, vocab + 1, dtype=jnp.int32)
    out2 = embedder_forward(src2, fused_bf16, num_embeddings=vocab + 1, d_model=d_model)
    out2 = jax.block_until_ready(out2).astype(jnp.float32)
    ref2 = reference(src2)
    assert out2.shape == (B2, S2, d_model), out2.shape
    assert jnp.allclose(out2, ref2, atol=3e-2, rtol=3e-2), float(
        jnp.max(jnp.abs(out2 - ref2)))

    print("KERNEL_OK")
</pallas_src>

<mosaic_0001>
module attributes {stable_mosaic.version = 11 : i64} {
  func.func @_fuse_table_kernel(%arg0: memref<128x128xf32, #tpu.memory_space<vmem>>, %arg1: memref<128x128xf32, #tpu.memory_space<vmem>>, %arg2: memref<1x128xf32, #tpu.memory_space<vmem>>, %arg3: memref<128x128xf32, #tpu.memory_space<vmem>>) attributes {dimension_semantics = [], scalar_prefetch = 0 : i64, scratch_operands = 0 : i64, tpu.core_type = #tpu.core_type<tc>} {
    %c0 = arith.constant 0 : index
    %c0_0 = arith.constant 0 : index
    %0 = vector.load %arg0[%c0, %c0_0] : memref<128x128xf32, #tpu.memory_space<vmem>>, vector<128x128xf32>
    %c0_1 = arith.constant 0 : index
    %c0_2 = arith.constant 0 : index
    %1 = vector.load %arg1[%c0_1, %c0_2] : memref<128x128xf32, #tpu.memory_space<vmem>>, vector<128x128xf32>
    %cst = arith.constant dense<0.000000e+00> : vector<128x128xf32>
    %2 = tpu.matmul %0, %1, %cst {dimension_numbers = #tpu.dot_dimension_numbers<[1], [0], [0], [1], [0, 0, 1, 1], [], []>} : vector<128x128xf32>, vector<128x128xf32>, vector<128x128xf32> -> vector<128x128xf32>
    %c0_3 = arith.constant 0 : index
    %c0_4 = arith.constant 0 : index
    %3 = vector.load %arg2[%c0_3, %c0_4] : memref<1x128xf32, #tpu.memory_space<vmem>>, vector<1x128xf32>
    %4 = vector.broadcast %3 : vector<1x128xf32> to vector<128x128xf32>
    %5 = arith.addf %2, %4 : vector<128x128xf32>
    %6 = tpu.iota {dimensions = array<i32: 0>} : vector<128x128xi32>
    %c119_i32 = arith.constant 119 : i32
    %7 = vector.broadcast %c119_i32 : i32 to vector<128x128xi32>
    %8 = arith.cmpi slt, %6, %7 : vector<128x128xi32>
    %cst_5 = arith.constant 0.000000e+00 : f32
    %9 = vector.broadcast %cst_5 : f32 to vector<128x128xf32>
    %10 = arith.select %8, %5, %9 : vector<128x128xi1>, vector<128x128xf32>
    %c0_6 = arith.constant 0 : index
    %c0_7 = arith.constant 0 : index
    %11 = vector.load %arg3[%c0_6, %c0_7] : memref<128x128xf32, #tpu.memory_space<vmem>>, vector<128x128xf32>
    tpu.vector_store %arg3[%c0_6, %c0_7], %10 {strides = array<i32>} : memref<128x128xf32, #tpu.memory_space<vmem>>, vector<128x128xf32>,
    return
  }
}

</mosaic_0001>

<bundles_post_ra>
// kernel: prepare_fused_table.1
= control target key start
LH: loop header
LB: loop body
LE: loop exit
PB: predicated region body
PF: predicated region fallthrough
CT: control target
= control target key end

     0   :  { %s404_s0 = inlined_call_operand.vmem [shape: f32[128,128], index: 0, kind: input, shape index: {}]   ;;  %s405_s1 = inlined_call_operand.vmem [shape: f32[128,128], index: 1, kind: input, shape index: {}]   ;;  %s406_s2 = inlined_call_operand.vmem [shape: f32[1,128], index: 2, kind: input, shape index: {}]   ;;  %s407_s3 = inlined_call_operand.hbm [shape: f32[128,128], index: 3, kind: output, shape index: {}]  }
   0x1   :  { %v46_v0 = vld [vmem:[%s405_s1 + $0x78] sm:$0xff]  ;;  %v45_v1 = vld [vmem:[%s405_s1 + $0x70] sm:$0xff]  ;;  %v44_v2 = vld [vmem:[%s405_s1 + $0x68] sm:$0xff] }
   0x2   :  { %200 = vmatpush.msra.mxu2 %v46_v0  ;;  %201 = vmatpush.msra.mxu3 %v46_v0  ;;  %v43_v3 = vld [vmem:[%s405_s1 + $0x60] sm:$0xff]  ;;  %v42_v4 = vld [vmem:[%s405_s1 + $0x58] sm:$0xff] }
   0x3   :  { %51 = vmatpush.msra.mxu0 %v46_v0  ;;  %199 = vmatpush.msra.mxu1 %v46_v0 }
   0x4   :  { %203 = vmatpush.msra.mxu2 %v45_v1  ;;  %204 = vmatpush.msra.mxu3 %v45_v1 }
   0x5   :  { %52 = vmatpush.msra.mxu0 %v45_v1  ;;  %202 = vmatpush.msra.mxu1 %v45_v1 }
   0x6   :  { %206 = vmatpush.msra.mxu2 %v44_v2  ;;  %207 = vmatpush.msra.mxu3 %v44_v2 }
   0x7   :  { %53 = vmatpush.msra.mxu0 %v44_v2  ;;  %205 = vmatpush.msra.mxu1 %v44_v2 }
   0x8   :  { %209 = vmatpush.msra.mxu2 %v43_v3  ;;  %210 = vmatpush.msra.mxu3 %v43_v3 }
   0x9   :  { %8 = vsyncpa [#allocation3], 0  ;;  %v41_v5 = vld [vmem:[%s405_s1 + $0x50] sm:$0xff]  ;;  %54 = vmatpush.msra.mxu0 %v43_v3  ;;  %208 = vmatpush.msra.mxu1 %v43_v3  ;;  %v40_v6 = vld [vmem:[%s405_s1 + $0x48] sm:$0xff]  ;;  %v278_v33 = vmov 0.0   ;;  %v116_v44 = vlaneseq  ;;  %s187_s24 = sshll.u32 %s407_s3, 4  ;;  %s188_s24 = int_to_ptr.hbm [resolvable:$true] %s187_s24 }
   0xa   :  { %212 = vmatpush.msra.mxu2 %v42_v4  ;;  %213 = vmatpush.msra.mxu3 %v42_v4  ;;  %v39_v7 = vld [vmem:[%s405_s1 + $0x40] sm:$0xff]  ;;  %v38_v8 = vld [vmem:[%s405_s1 + $0x38] sm:$0xff]  ;;  %v37_v9 = vld [vmem:[%s405_s1 + $0x30] sm:$0xff]  ;;  %180 = vst [vmem:[#allocation2 + $0x78] sm:$0xff] %v278_v33  ;;  %s280_s25 = smov 128   ;;  %s281_s26 = smov 8  }
   0xb   :  { %55 = vmatpush.msra.mxu0 %v42_v4  ;;  %211 = vmatpush.msra.mxu1 %v42_v4  ;;  %v36_v10 = vld [vmem:[%s405_s1 + $0x28] sm:$0xff]  ;;  %v35_v11 = vld [vmem:[%s405_s1 + $0x20] sm:$0xff]  ;;  %v34_v12 = vld [vmem:[%s405_s1 + $0x18] sm:$0xff]  ;;  %v117_v49 = vshrl.u32 %v116_v44, 7 }
   0xc   :  { %215 = vmatpush.msra.mxu2 %v41_v5  ;;  %216 = vmatpush.msra.mxu3 %v41_v5  ;;  %v33_v13 = vld [vmem:[%s405_s1 + $0x10] sm:$0xff]  ;;  %v32_v14 = vld [vmem:[%s405_s1 + $0x8] sm:$0xff]  ;;  %v31_v15 = vld [vmem:[%s405_s1] sm:$0xff] }
   0xd   :  { %56 = vmatpush.msra.mxu0 %v41_v5  ;;  %214 = vmatpush.msra.mxu1 %v41_v5  ;;  %v23_v16 = vld [vmem:[%s404_s0 + $0x40] sm:$0xff]  ;;  %v24_v20 = vld [vmem:[%s404_s0 + $0x48] sm:$0xff]  ;;  %v25_v24 = vld [vmem:[%s404_s0 + $0x50] sm:$0xff]  ;;  %v131_v54 = vadd.s32 112, %v117_v49 }
   0xe   :  { %218 = vmatpush.msra.mxu2 %v40_v6  ;;  %219 = vmatpush.msra.mxu3 %v40_v6  ;;  %v27_v17 = vld [vmem:[%s404_s0 + $0x60] sm:$0xff]  ;;  %v28_v21 = vld [vmem:[%s404_s0 + $0x68] sm:$0xff]  ;;  %v29_v25 = vld [vmem:[%s404_s0 + $0x70] sm:$0xff] }
   0xf   :  { %57 = vmatpush.msra.mxu0 %v40_v6  ;;  %217 = vmatpush.msra.mxu1 %v40_v6  ;;  %v15_v18 = vld [vmem:[%s404_s0] sm:$0xff]  ;;  %v16_v22 = vld [vmem:[%s404_s0 + $0x8] sm:$0xff]  ;;  %v17_v26 = vld [vmem:[%s404_s0 + $0x10] sm:$0xff]  ;;  %vm147_vm0 = vcmp.lt.s32.totalorder %v131_v54, 119 }
  0x10   :  { %221 = vmatpush.msra.mxu2 %v39_v7  ;;  %222 = vmatpush.msra.mxu3 %v39_v7  ;;  %v19_v19 = vld [vmem:[%s404_s0 + $0x20] sm:$0xff]  ;;  %v20_v23 = vld [vmem:[%s404_s0 + $0x28] sm:$0xff]  ;;  %v21_v27 = vld [vmem:[%s404_s0 + $0x30] sm:$0xff] }
  0x11   :  { %58 = vmatpush.msra.mxu0 %v39_v7  ;;  %220 = vmatpush.msra.mxu1 %v39_v7  ;;  %v26_v28 = vld [vmem:[%s404_s0 + $0x58] sm:$0xff]  ;;  %v251_v32 = vld [vmem:[%s406_s2] ss:$0 sm:$0xff] }
  0x12   :  { %224 = vmatpush.msra.mxu2 %v38_v8  ;;  %225 = vmatpush.msra.mxu3 %v38_v8  ;;  %v30_v29 = vld [vmem:[%s404_s0 + $0x78] sm:$0xff] }
  0x13   :  { %59 = vmatpush.msra.mxu0 %v38_v8  ;;  %223 = vmatpush.msra.mxu1 %v38_v8  ;;  %v18_v30 = vld [vmem:[%s404_s0 + $0x18] sm:$0xff] }
  0x14   :  { %227 = vmatpush.msra.mxu2 %v37_v9  ;;  %228 = vmatpush.msra.mxu3 %v37_v9  ;;  %v22_v31 = vld [vmem:[%s404_s0 + $0x38] sm:$0xff]  ;;  %s279_s0 = smov [#allocation2]  }
  0x15   :  { %60 = vmatpush.msra.mxu0 %v37_v9  ;;  %226 = vmatpush.msra.mxu1 %v37_v9  ;;  %s185_s2 = sshll.u32 %s279_s0, 4  ;;  %s186_s2 = int_to_ptr.vmem [resolvable:$true] %s185_s2 }
  0x16   :  { %230 = vmatpush.msra.mxu2 %v36_v10  ;;  %231 = vmatpush.msra.mxu3 %v36_v10 }
  0x17   :  { %61 = vmatpush.msra.mxu0 %v36_v10  ;;  %229 = vmatpush.msra.mxu1 %v36_v10 }
  0x18   :  { %233 = vmatpush.msra.mxu2 %v35_v11  ;;  %234 = vmatpush.msra.mxu3 %v35_v11 }
  0x19   :  { %62 = vmatpush.msra.mxu0 %v35_v11  ;;  %232 = vmatpush.msra.mxu1 %v35_v11 }
  0x1a   :  { %236 = vmatpush.msra.mxu2 %v34_v12  ;;  %237 = vmatpush.msra.mxu3 %v34_v12 }
  0x1b   :  { %63 = vmatpush.msra.mxu0 %v34_v12  ;;  %235 = vmatpush.msra.mxu1 %v34_v12 }
  0x1c   :  { %239 = vmatpush.msra.mxu2 %v33_v13  ;;  %240 = vmatpush.msra.mxu3 %v33_v13 }
  0x1d   :  { %64 = vmatpush.msra.mxu0 %v33_v13  ;;  %238 = vmatpush.msra.mxu1 %v33_v13 }
  0x1e   :  { %242 = vmatpush.msra.mxu2 %v32_v14  ;;  %243 = vmatpush.msra.mxu3 %v32_v14 }
  0x1f   :  { %65 = vmatpush.msra.mxu0 %v32_v14  ;;  %241 = vmatpush.msra.mxu1 %v32_v14 }
  0x20   :  { %245 = vmatpush.msra.mxu2 %v31_v15  ;;  %246 = vmatpush.msra.mxu3 %v31_v15 }
  0x21   :  { %91 = vmatmul.f32.vlgmr.msra.gmra.mxu2 %v23_v16  ;;  %103 = vmatmul.f32.vlgmr.msra.gmra.mxu3 %v27_v17 }
  0x22   :  { %66 = vmatpush.msra.mxu0 %v31_v15  ;;  %244 = vmatpush.msra.mxu1 %v31_v15 }
  0x23   :  { %67 = vmatmul.f32.vlgmr.msra.gmra.mxu0 %v15_v18  ;;  %79 = vmatmul.f32.vlgmr.msra.gmra.mxu1 %v19_v19 }
  0x29   :  { %94 = vmatmul.f32.gmra.mxu2 %v24_v20  ;;  %106 = vmatmul.f32.gmra.mxu3 %v28_v21 }
  0x2b   :  { %70 = vmatmul.f32.gmra.mxu0 %v16_v22  ;;  %82 = vmatmul.f32.gmra.mxu1 %v20_v23 }
  0x31   :  { %97 = vmatmul.f32.gmra.mxu2 %v25_v24  ;;  %109 = vmatmul.f32.gmra.mxu3 %v29_v25 }
  0x33   :  { %73 = vmatmul.f32.gmra.mxu0 %v17_v26  ;;  %85 = vmatmul.f32.gmra.mxu1 %v21_v27 }
  0x39   :  { %100 = vmatmul.f32.gmra.mxu2 %v26_v28  ;;  %112 = vmatmul.f32.gmra.mxu3 %v30_v29 }
  0x3b   :  { %76 = vmatmul.f32.gmra.mxu0 %v18_v30  ;;  %88 = vmatmul.f32.gmra.mxu1 %v22_v31 }
  0xa0   :  { %v68_v34 = vpop.f32.mrf.mxu0  ;;  %v80_v35 = vpop.f32.mrf.mxu1 }
  0xa1   :  { %v69_v36 = vadd.f32 %v251_v32, %v68_v34  ;;  %v81_v37 = vadd.f32 %v251_v32, %v80_v35 }
  0xa3   :  { %165 = vst [vmem:[#allocation2] sm:$0xff] %v69_v36 }
  0xa4   :  { %169 = vst [vmem:[#allocation2 + $0x20] sm:$0xff] %v81_v37  ;;  %v92_v38 = vpop.f32.mrf.mxu2  ;;  %v104_v39 = vpop.f32.mrf.mxu3 }
  0xa5   :  { %v93_v40 = vadd.f32 %v251_v32, %v92_v38  ;;  %v105_v41 = vadd.f32 %v251_v32, %v104_v39 }
  0xa7   :  { %173 = vst [vmem:[#allocation2 + $0x40] sm:$0xff] %v93_v40 }
  0xa8   :  { %177 = vst [vmem:[#allocation2 + $0x60] sm:$0xff] %v105_v41  ;;  %v71_v42 = vpop.f32.mrf.mxu0  ;;  %v83_v43 = vpop.f32.mrf.mxu1 }
  0xa9   :  { %v72_v45 = vadd.f32 %v251_v32, %v71_v42  ;;  %v84_v46 = vadd.f32 %v251_v32, %v83_v43 }
  0xab   :  { %166 = vst [vmem:[#allocation2 + $0x8] sm:$0xff] %v72_v45 }
  0xac   :  { %170 = vst [vmem:[#allocation2 + $0x28] sm:$0xff] %v84_v46  ;;  %v95_v47 = vpop.f32.mrf.mxu2  ;;  %v107_v48 = vpop.f32.mrf.mxu3 }
  0xad   :  { %v96_v50 = vadd.f32 %v251_v32, %v95_v47  ;;  %v108_v51 = vadd.f32 %v251_v32, %v107_v48 }
  0xaf   :  { %174 = vst [vmem:[#allocation2 + $0x48] sm:$0xff] %v96_v50 }
  0xb0   :  { %178 = vst [vmem:[#allocation2 + $0x68] sm:$0xff] %v108_v51  ;;  %v74_v52 = vpop.f32.mrf.mxu0  ;;  %v86_v53 = vpop.f32.mrf.mxu1 }
  0xb1   :  { %v75_v55 = vadd.f32 %v251_v32, %v74_v52  ;;  %v87_v56 = vadd.f32 %v251_v32, %v86_v53 }
  0xb3   :  { %167 = vst [vmem:[#allocation2 + $0x10] sm:$0xff] %v75_v55 }
  0xb4   :  { %171 = vst [vmem:[#allocation2 + $0x30] sm:$0xff] %v87_v56  ;;  %v98_v57 = vpop.f32.mrf.mxu2  ;;  %v110_v58 = vpop.f32.mrf.mxu3 }
  0xb5   :  { %v99_v59 = vadd.f32 %v251_v32, %v98_v57  ;;  %v111_v60 = vadd.f32 %v251_v32, %v110_v58 }
  0xb7   :  { %175 = vst [vmem:[#allocation2 + $0x50] sm:$0xff] %v99_v59  ;;  %v163_v61 = vsel %vm147_vm0, %v111_v60, 0.0 }
  0xb8   :  { %179 = vst [vmem:[#allocation2 + $0x70] sm:$0xff] %v163_v61  ;;  %v77_v62 = vpop.f32.mrf.mxu0  ;;  %v89_v63 = vpop.f32.mrf.mxu1 }
  0xb9   :  { %v78_v0 = vadd.f32 %v251_v32, %v77_v62  ;;  %v90_v1 = vadd.f32 %v251_v32, %v89_v63 }
  0xbb   :  { %168 = vst [vmem:[#allocation2 + $0x18] sm:$0xff] %v78_v0 }
  0xbc   :  { %172 = vst [vmem:[#allocation2 + $0x38] sm:$0xff] %v90_v1  ;;  %v101_v2 = vpop.f32.mrf.mxu2  ;;  %v113_v3 = vpop.f32.mrf.mxu3 }
  0xbd   :  { %v102_v4 = vadd.f32 %v251_v32, %v101_v2 }
  0xbf   :  { %176 = vst [vmem:[#allocation2 + $0x58] sm:$0xff] %v102_v4 }
  0xc0   :  { %193 = dma.vmem_to_hbm [thread:$0]  %s186_s2, 2048, %s188_s24, [#allocation3], %s280_s25, %s280_s25, %s281_s26  }
  0xc1   :  { %276 = dma.done.wait [#allocation3], 2048  }
  0xc2   :  { %277 = vsyncadd [#allocation3], 4294965248 }
  0xc3   :  { %198 = vsyncpa [#allocation3], 1 }

</bundles_post_ra>
